<compile_context>
chip_gen: v7x
topology: tpu7x:2x2x1
jax: 0.10.0
libtpu: 0.0.40
codegen_flags: <defaults>
</compile_context>

<pallas_src>
import functools

import jax
import jax.numpy as jnp
from jax.experimental import pallas as pl
from jax.experimental.pallas import tpu as pltpu

_LANE = 128
_SUB = 8            # sublane chunk inside the kernel
_EPS2 = 1e-24       # (F.normalize eps = 1e-12) squared


def _round_up(x, m):
    return -(-x // m) * m


def _cam_opt_kernel(c_ref, d_ref, o_ref, *, n_chunks):
    """c_ref: (16, bt, 128) camtoworld components (f32 or bf16);
    d_ref: (9, bt, 128) f32 pose deltas; o_ref: (16, bt, 128) f32 output."""

    @pl.loop(0, n_chunks)
    def _(chunk):
        off = pl.multiple_of(chunk * _SUB, _SUB)
        sl = pl.ds(off, _SUB)

        # translation delta
        d0 = d_ref[0, sl, :]
        d1 = d_ref[1, sl, :]
        d2 = d_ref[2, sl, :]

        # drot + identity buffer [1, 0, 0, 0, 1, 0]
        a10 = d_ref[3, sl, :] + 1.0
        a11 = d_ref[4, sl, :]
        a12 = d_ref[5, sl, :]
        a20 = d_ref[6, sl, :]
        a21 = d_ref[7, sl, :] + 1.0
        a22 = d_ref[8, sl, :]

        # b1 = normalize(a1): x / max(||x||, eps) == x * rsqrt(max(||x||^2, eps^2))
        inv1 = jax.lax.rsqrt(jnp.maximum(a10 * a10 + a11 * a11 + a12 * a12, _EPS2))
        b10, b11, b12 = a10 * inv1, a11 * inv1, a12 * inv1

        # b2 = normalize(a2 - (b1 . a2) b1)
        dot12 = b10 * a20 + b11 * a21 + b12 * a22
        c20 = a20 - dot12 * b10
        c21 = a21 - dot12 * b11
        c22 = a22 - dot12 * b12
        inv2 = jax.lax.rsqrt(jnp.maximum(c20 * c20 + c21 * c21 + c22 * c22, _EPS2))
        b20, b21, b22 = c20 * inv2, c21 * inv2, c22 * inv2

        # b3 = b1 x b2
        b30 = b11 * b22 - b12 * b21
        b31 = b12 * b20 - b10 * b22
        b32 = b10 * b21 - b11 * b20

        # First three rows of T (4th row is [0,0,0,1], folded into the j==3 case).
        t = (
            (b10, b11, b12, d0),
            (b20, b21, b22, d1),
            (b30, b31, b32, d2),
        )

        # out[i, j] = sum_k C[i, k] * T[k, j]; unrolled VPU math, streamed stores.
        for i in range(4):
            ci0 = c_ref[4 * i + 0, sl, :].astype(jnp.float32)
            ci1 = c_ref[4 * i + 1, sl, :].astype(jnp.float32)
            ci2 = c_ref[4 * i + 2, sl, :].astype(jnp.float32)
            ci3 = c_ref[4 * i + 3, sl, :].astype(jnp.float32)
            for j in range(4):
                acc = ci0 * t[0][j] + ci1 * t[1][j] + ci2 * t[2][j]
                if j == 3:
                    acc = acc + ci3   # C[i,3] * T[3,3] with T[3,3] == 1
                o_ref[4 * i + j, sl, :] = acc


def camera_opt_forward(camtoworlds, embed_ids, embed_weight, *, max_sub_tile=512):
    """camtoworlds: (..., 4, 4) (f32 or bf16), embed_ids: (...,) int, embed_weight: (n, 9) f32."""
    assert camtoworlds.shape[-2:] == (4, 4)
    batch_dims = camtoworlds.shape[:-2]
    assert embed_ids.shape == batch_dims
    assert max_sub_tile % _SUB == 0 and max_sub_tile > 0

    B = 1
    for s in batch_dims:
        B *= int(s)

    keep_dtype = (camtoworlds.dtype == jnp.bfloat16) or (camtoworlds.dtype == jnp.float32)
    cam_dtype = camtoworlds.dtype if keep_dtype else jnp.float32
    cams = camtoworlds.reshape(B, 16).astype(cam_dtype)
    ids = embed_ids.reshape(B).astype(jnp.int32)

    # --- tiling: batch -> (rows_p, 128); rows_p split into n_tiles tiles of bt sublanes ---
    rows = -(-B // _LANE)                       # ceil(B / 128)
    rows8 = _round_up(max(rows, 1), _SUB)       # always a multiple of 8 sublanes
    n_tiles = max(1, -(-rows8 // max_sub_tile))
    if n_tiles == 1 and rows8 > _SUB:
        n_tiles = 2                             # >= 2 tiles so both v7x TCs get work
    bt = _round_up(-(-rows8 // n_tiles), _SUB)  # multiple of 8, <= max_sub_tile
    rows_p = bt * n_tiles
    Bp = rows_p * _LANE

    # --- host glue: gather deltas directly in component-major (9, Bp) layout ---
    if Bp != B:
        ids = jnp.pad(ids, (0, Bp - B))
    d3 = jnp.take(embed_weight.astype(jnp.float32).T, ids, axis=1).reshape(9, rows_p, _LANE)

    # TODO(synk): eliminate these transposes by keeping the component-major layout
    # persistent across the pipeline; they exist only because the interface is (B,4,4).
    c = cams
    if Bp != B:
        c = jnp.pad(c, ((0, Bp - B), (0, 0)))
    c3 = c.T.reshape(16, rows_p, _LANE)                               # (16, rows_p, 128)

    # Double-buffered block footprint; raise scoped VMEM explicitly (v5e default is
    # 16 MiB), but never above v7x's 64 MiB physical VMEM.
    blk_bytes = (16 * cams.dtype.itemsize + (9 + 16) * 4) * bt * _LANE
    vmem_limit = int(min(64 << 20, max(32 << 20, 3 * blk_bytes)))

    kernel = functools.partial(_cam_opt_kernel, n_chunks=bt // _SUB)
    out3 = pl.pallas_call(
        kernel,
        out_shape=jax.ShapeDtypeStruct((16, rows_p, _LANE), jnp.float32),
        grid=(n_tiles,),
        in_specs=[
            pl.BlockSpec((16, bt, _LANE), lambda i: (0, i, 0)),
            pl.BlockSpec((9, bt, _LANE), lambda i: (0, i, 0)),
        ],
        out_specs=pl.BlockSpec((16, bt, _LANE), lambda i: (0, i, 0)),
        compiler_params=pltpu.CompilerParams(
            dimension_semantics=("parallel",),
            vmem_limit_bytes=vmem_limit,
        ),
    )(c3, d3)

    out = out3.reshape(16, Bp).T[:B].reshape(B, 4, 4)
    return out.reshape(*batch_dims, 4, 4)


def _reference_forward(camtoworlds, embed_ids, embed_weight):
    """Pure-JAX reference matching the PyTorch module."""
    pose_deltas = embed_weight[embed_ids]
    dx, drot = pose_deltas[..., :3], pose_deltas[..., 3:]
    identity = jnp.array([1.0, 0.0, 0.0, 0.0, 1.0, 0.0], jnp.float32)
    d6 = drot + identity
    a1, a2 = d6[..., :3], d6[..., 3:]
    b1 = a1 / jnp.maximum(jnp.linalg.norm(a1, axis=-1, keepdims=True), 1e-12)
    b2 = a2 - jnp.sum(b1 * a2, axis=-1, keepdims=True) * b1
    b2 = b2 / jnp.maximum(jnp.linalg.norm(b2, axis=-1, keepdims=True), 1e-12)
    b3 = jnp.cross(b1, b2)
    rot = jnp.stack((b1, b2, b3), axis=-2)
    B = camtoworlds.shape[0]
    transform = jnp.tile(jnp.eye(4, dtype=jnp.float32), (B, 1, 1))
    transform = transform.at[..., :3, :3].set(rot)
    transform = transform.at[..., :3, 3].set(dx)
    return jnp.matmul(camtoworlds.astype(jnp.float32), transform)


if __name__ == "__main__":
    key = jax.random.PRNGKey(0)
    k1, k2, k3 = jax.random.split(key, 3)

    n_cams = 32   # embedding table size
    B = 2000      # batch of cameras (non-multiple of 128 -> exercises padding)

    # Deterministic parameter init (CameraOptModule.random_init(std=0.05) analogue).
    embed_weight = 0.05 * jax.random.normal(k1, (n_cams, 9), dtype=jnp.float32)

    # Deterministic example inputs: random rigid-ish camtoworld matrices.
    camtoworlds = jax.random.normal(k2, (B, 4, 4), dtype=jnp.float32)
    camtoworlds = camtoworlds.at[:, 3, :].set(
        jnp.array([0.0, 0.0, 0.0, 1.0], jnp.float32)
    )
    embed_ids = jax.random.randint(k3, (B,), 0, n_cams, dtype=jnp.int32)

    # Default tiling: B=2000 -> 16 sublane rows -> 2 tiles of 8 sublanes, so the
    # pipelined multi-tile (+ megacore-parallel) path is exercised even at small B.
    out = camera_opt_forward(camtoworlds, embed_ids, embed_weight)
    out = jax.block_until_ready(out)

    ref = _reference_forward(camtoworlds, embed_ids, embed_weight)
    assert out.shape == (B, 4, 4)
    # Rotation entries are O(1); 1e-4 leaves headroom for the EUP rsqrt path.
    assert jnp.allclose(out, ref, atol=1e-4, rtol=1e-4), "mismatch vs reference"

    print("KERNEL_OK")
</pallas_src>

<mosaic_0001>
module attributes {stable_mosaic.version = 11 : i64} {
  func.func @_cam_opt_kernel(%arg0: i32, %arg1: memref<16x8x128xf32, #tpu.memory_space<vmem>>, %arg2: memref<9x8x128xf32, #tpu.memory_space<vmem>>, %arg3: memref<16x8x128xf32, #tpu.memory_space<vmem>>) attributes {dimension_semantics = [#tpu.dimension_semantics<parallel>], iteration_bounds = array<i64: 2>, scalar_prefetch = 0 : i64, scratch_operands = 0 : i64, tpu.core_type = #tpu.core_type<tc>, window_params = [{transform_indices = @transform_0, window_bounds = array<i64: 16, 8, 128>}, {transform_indices = @transform_1, window_bounds = array<i64: 9, 8, 128>}, {transform_indices = @transform_2, window_bounds = array<i64: 16, 8, 128>}]} {
    %c0_i32 = arith.constant 0 : i32
    %c1_i32 = arith.constant 1 : i32
    %0 = arith.muli %c0_i32, %c1_i32 : i32
    %c0_i32_0 = arith.constant 0 : i32
    %1 = arith.addi %c0_i32_0, %0 : i32
    %c8_i32 = arith.constant 8 : i32
    %2 = arith.muli %1, %c8_i32 : i32
    %3 = tpu.assume_multiple %2, 8 : i32
    %c0 = arith.constant 0 : index
    %4 = arith.index_cast %3 : i32 to index
    %c0_1 = arith.constant 0 : index
    %5 = vector.load %arg2[%c0, %4, %c0_1] : memref<9x8x128xf32, #tpu.memory_space<vmem>>, vector<1x8x128xf32>
    %6 = vector.shape_cast %5 : vector<1x8x128xf32> to vector<8x128xf32>
    %c1 = arith.constant 1 : index
    %7 = arith.index_cast %3 : i32 to index
    %c0_2 = arith.constant 0 : index
    %8 = vector.load %arg2[%c1, %7, %c0_2] : memref<9x8x128xf32, #tpu.memory_space<vmem>>, vector<1x8x128xf32>
    %9 = vector.shape_cast %8 : vector<1x8x128xf32> to vector<8x128xf32>
    %c2 = arith.constant 2 : index
    %10 = arith.index_cast %3 : i32 to index
    %c0_3 = arith.constant 0 : index
    %11 = vector.load %arg2[%c2, %10, %c0_3] : memref<9x8x128xf32, #tpu.memory_space<vmem>>, vector<1x8x128xf32>
    %12 = vector.shape_cast %11 : vector<1x8x128xf32> to vector<8x128xf32>
    %c3 = arith.constant 3 : index
    %13 = arith.index_cast %3 : i32 to index
    %c0_4 = arith.constant 0 : index
    %14 = vector.load %arg2[%c3, %13, %c0_4] : memref<9x8x128xf32, #tpu.memory_space<vmem>>, vector<1x8x128xf32>
    %15 = vector.shape_cast %14 : vector<1x8x128xf32> to vector<8x128xf32>
    %cst = arith.constant 1.000000e+00 : f32
    %16 = vector.broadcast %cst : f32 to vector<8x128xf32>
    %17 = arith.addf %15, %16 : vector<8x128xf32>
    %c4 = arith.constant 4 : index
    %18 = arith.index_cast %3 : i32 to index
    %c0_5 = arith.constant 0 : index
    %19 = vector.load %arg2[%c4, %18, %c0_5] : memref<9x8x128xf32, #tpu.memory_space<vmem>>, vector<1x8x128xf32>
    %20 = vector.shape_cast %19 : vector<1x8x128xf32> to vector<8x128xf32>
    %c5 = arith.constant 5 : index
    %21 = arith.index_cast %3 : i32 to index
    %c0_6 = arith.constant 0 : index
    %22 = vector.load %arg2[%c5, %21, %c0_6] : memref<9x8x128xf32, #tpu.memory_space<vmem>>, vector<1x8x128xf32>
    %23 = vector.shape_cast %22 : vector<1x8x128xf32> to vector<8x128xf32>
    %c6 = arith.constant 6 : index
    %24 = arith.index_cast %3 : i32 to index
    %c0_7 = arith.constant 0 : index
    %25 = vector.load %arg2[%c6, %24, %c0_7] : memref<9x8x128xf32, #tpu.memory_space<vmem>>, vector<1x8x128xf32>
    %26 = vector.shape_cast %25 : vector<1x8x128xf32> to vector<8x128xf32>
    %c7 = arith.constant 7 : index
    %27 = arith.index_cast %3 : i32 to index
    %c0_8 = arith.constant 0 : index
    %28 = vector.load %arg2[%c7, %27, %c0_8] : memref<9x8x128xf32, #tpu.memory_space<vmem>>, vector<1x8x128xf32>
    %29 = vector.shape_cast %28 : vector<1x8x128xf32> to vector<8x128xf32>
    %cst_9 = arith.constant 1.000000e+00 : f32
    %30 = vector.broadcast %cst_9 : f32 to vector<8x128xf32>
    %31 = arith.addf %29, %30 : vector<8x128xf32>
    %c8 = arith.constant 8 : index
    %32 = arith.index_cast %3 : i32 to index
    %c0_10 = arith.constant 0 : index
    %33 = vector.load %arg2[%c8, %32, %c0_10] : memref<9x8x128xf32, #tpu.memory_space<vmem>>, vector<1x8x128xf32>
    %34 = vector.shape_cast %33 : vector<1x8x128xf32> to vector<8x128xf32>
    %35 = arith.mulf %17, %17 : vector<8x128xf32>
    %36 = arith.mulf %20, %20 : vector<8x128xf32>
    %37 = arith.addf %35, %36 : vector<8x128xf32>
    %38 = arith.mulf %23, %23 : vector<8x128xf32>
    %39 = arith.addf %37, %38 : vector<8x128xf32>
    %cst_11 = arith.constant 1.000000e-24 : f32
    %40 = vector.broadcast %cst_11 : f32 to vector<8x128xf32>
    %41 = arith.maximumf %39, %40 : vector<8x128xf32>
    %42 = math.rsqrt %41 : vector<8x128xf32>
    %43 = arith.mulf %17, %42 : vector<8x128xf32>
    %44 = arith.mulf %20, %42 : vector<8x128xf32>
    %45 = arith.mulf %23, %42 : vector<8x128xf32>
    %46 = arith.mulf %43, %26 : vector<8x128xf32>
    %47 = arith.mulf %44, %31 : vector<8x128xf32>
    %48 = arith.addf %46, %47 : vector<8x128xf32>
    %49 = arith.mulf %45, %34 : vector<8x128xf32>
    %50 = arith.addf %48, %49 : vector<8x128xf32>
    %51 = arith.mulf %50, %43 : vector<8x128xf32>
    %52 = arith.subf %26, %51 : vector<8x128xf32>
    %53 = arith.mulf %50, %44 : vector<8x128xf32>
    %54 = arith.subf %31, %53 : vector<8x128xf32>
    %55 = arith.mulf %50, %45 : vector<8x128xf32>
    %56 = arith.subf %34, %55 : vector<8x128xf32>
    %57 = arith.mulf %52, %52 : vector<8x128xf32>
    %58 = arith.mulf %54, %54 : vector<8x128xf32>
    %59 = arith.addf %57, %58 : vector<8x128xf32>
    %60 = arith.mulf %56, %56 : vector<8x128xf32>
    %61 = arith.addf %59, %60 : vector<8x128xf32>
    %cst_12 = arith.constant 1.000000e-24 : f32
    %62 = vector.broadcast %cst_12 : f32 to vector<8x128xf32>
    %63 = arith.maximumf %61, %62 : vector<8x128xf32>
    %64 = math.rsqrt %63 : vector<8x128xf32>
    %65 = arith.mulf %52, %64 : vector<8x128xf32>
    %66 = arith.mulf %54, %64 : vector<8x128xf32>
    %67 = arith.mulf %56, %64 : vector<8x128xf32>
    %68 = arith.mulf %44, %67 : vector<8x128xf32>
    %69 = arith.mulf %45, %66 : vector<8x128xf32>
    %70 = arith.subf %68, %69 : vector<8x128xf32>
    %71 = arith.mulf %45, %65 : vector<8x128xf32>
    %72 = arith.mulf %43, %67 : vector<8x128xf32>
    %73 = arith.subf %71, %72 : vector<8x128xf32>
    %74 = arith.mulf %43, %66 : vector<8x128xf32>
    %75 = arith.mulf %44, %65 : vector<8x128xf32>
    %76 = arith.subf %74, %75 : vector<8x128xf32>
    %c0_13 = arith.constant 0 : index
    %77 = arith.index_cast %3 : i32 to index
    %c0_14 = arith.constant 0 : index
    %78 = vector.load %arg1[%c0_13, %77, %c0_14] : memref<16x8x128xf32, #tpu.memory_space<vmem>>, vector<1x8x128xf32>
    %79 = vector.shape_cast %78 : vector<1x8x128xf32> to vector<8x128xf32>
    %c1_15 = arith.constant 1 : index
    %80 = arith.index_cast %3 : i32 to index
    %c0_16 = arith.constant 0 : index
    %81 = vector.load %arg1[%c1_15, %80, %c0_16] : memref<16x8x128xf32, #tpu.memory_space<vmem>>, vector<1x8x128xf32>
    %82 = vector.shape_cast %81 : vector<1x8x128xf32> to vector<8x128xf32>
    %c2_17 = arith.constant 2 : index
    %83 = arith.index_cast %3 : i32 to index
    %c0_18 = arith.constant 0 : index
    %84 = vector.load %arg1[%c2_17, %83, %c0_18] : memref<16x8x128xf32, #tpu.memory_space<vmem>>, vector<1x8x128xf32>
    %85 = vector.shape_cast %84 : vector<1x8x128xf32> to vector<8x128xf32>
    %c3_19 = arith.constant 3 : index
    %86 = arith.index_cast %3 : i32 to index
    %c0_20 = arith.constant 0 : index
    %87 = vector.load %arg1[%c3_19, %86, %c0_20] : memref<16x8x128xf32, #tpu.memory_space<vmem>>, vector<1x8x128xf32>
    %88 = vector.shape_cast %87 : vector<1x8x128xf32> to vector<8x128xf32>
    %89 = arith.mulf %79, %43 : vector<8x128xf32>
    %90 = arith.mulf %82, %65 : vector<8x128xf32>
    %91 = arith.addf %89, %90 : vector<8x128xf32>
    %92 = arith.mulf %85, %70 : vector<8x128xf32>
    %93 = arith.addf %91, %92 : vector<8x128xf32>
    %c0_21 = arith.constant 0 : index
    %94 = arith.index_cast %3 : i32 to index
    %c0_22 = arith.constant 0 : index
    %95 = vector.load %arg3[%c0_21, %94, %c0_22] : memref<16x8x128xf32, #tpu.memory_space<vmem>>, vector<1x8x128xf32>
    %96 = vector.shape_cast %95 : vector<1x8x128xf32> to vector<8x128xf32>
    %97 = vector.shape_cast %93 : vector<8x128xf32> to vector<1x8x128xf32>
    tpu.vector_store %arg3[%c0_21, %94, %c0_22], %97 {strides = array<i32>} : memref<16x8x128xf32, #tpu.memory_space<vmem>>, vector<1x8x128xf32>,
    %98 = arith.mulf %79, %44 : vector<8x128xf32>
    %99 = arith.mulf %82, %66 : vector<8x128xf32>
    %100 = arith.addf %98, %99 : vector<8x128xf32>
    %101 = arith.mulf %85, %73 : vector<8x128xf32>
    %102 = arith.addf %100, %101 : vector<8x128xf32>
    %c1_23 = arith.constant 1 : index
    %103 = arith.index_cast %3 : i32 to index
    %c0_24 = arith.constant 0 : index
    %104 = vector.load %arg3[%c1_23, %103, %c0_24] : memref<16x8x128xf32, #tpu.memory_space<vmem>>, vector<1x8x128xf32>
    %105 = vector.shape_cast %104 : vector<1x8x128xf32> to vector<8x128xf32>
    %106 = vector.shape_cast %102 : vector<8x128xf32> to vector<1x8x128xf32>
    tpu.vector_store %arg3[%c1_23, %103, %c0_24], %106 {strides = array<i32>} : memref<16x8x128xf32, #tpu.memory_space<vmem>>, vector<1x8x128xf32>,
    %107 = arith.mulf %79, %45 : vector<8x128xf32>
    %108 = arith.mulf %82, %67 : vector<8x128xf32>
    %109 = arith.addf %107, %108 : vector<8x128xf32>
    %110 = arith.mulf %85, %76 : vector<8x128xf32>
    %111 = arith.addf %109, %110 : vector<8x128xf32>
    %c2_25 = arith.constant 2 : index
    %112 = arith.index_cast %3 : i32 to index
    %c0_26 = arith.constant 0 : index
    %113 = vector.load %arg3[%c2_25, %112, %c0_26] : memref<16x8x128xf32, #tpu.memory_space<vmem>>, vector<1x8x128xf32>
    %114 = vector.shape_cast %113 : vector<1x8x128xf32> to vector<8x128xf32>
    %115 = vector.shape_cast %111 : vector<8x128xf32> to vector<1x8x128xf32>
    tpu.vector_store %arg3[%c2_25, %112, %c0_26], %115 {strides = array<i32>} : memref<16x8x128xf32, #tpu.memory_space<vmem>>, vector<1x8x128xf32>,
    %116 = arith.mulf %79, %6 : vector<8x128xf32>
    %117 = arith.mulf %82, %9 : vector<8x128xf32>
    %118 = arith.addf %116, %117 : vector<8x128xf32>
    %119 = arith.mulf %85, %12 : vector<8x128xf32>
    %120 = arith.addf %118, %119 : vector<8x128xf32>
    %121 = arith.addf %120, %88 : vector<8x128xf32>
    %c3_27 = arith.constant 3 : index
    %122 = arith.index_cast %3 : i32 to index
    %c0_28 = arith.constant 0 : index
    %123 = vector.load %arg3[%c3_27, %122, %c0_28] : memref<16x8x128xf32, #tpu.memory_space<vmem>>, vector<1x8x128xf32>
    %124 = vector.shape_cast %123 : vector<1x8x128xf32> to vector<8x128xf32>
    %125 = vector.shape_cast %121 : vector<8x128xf32> to vector<1x8x128xf32>
    tpu.vector_store %arg3[%c3_27, %122, %c0_28], %125 {strides = array<i32>} : memref<16x8x128xf32, #tpu.memory_space<vmem>>, vector<1x8x128xf32>,
    %c4_29 = arith.constant 4 : index
    %126 = arith.index_cast %3 : i32 to index
    %c0_30 = arith.constant 0 : index
    %127 = vector.load %arg1[%c4_29, %126, %c0_30] : memref<16x8x128xf32, #tpu.memory_space<vmem>>, vector<1x8x128xf32>
    %128 = vector.shape_cast %127 : vector<1x8x128xf32> to vector<8x128xf32>
    %c5_31 = arith.constant 5 : index
    %129 = arith.index_cast %3 : i32 to index
    %c0_32 = arith.constant 0 : index
    %130 = vector.load %arg1[%c5_31, %129, %c0_32] : memref<16x8x128xf32, #tpu.memory_space<vmem>>, vector<1x8x128xf32>
    %131 = vector.shape_cast %130 : vector<1x8x128xf32> to vector<8x128xf32>
    %c6_33 = arith.constant 6 : index
    %132 = arith.index_cast %3 : i32 to index
    %c0_34 = arith.constant 0 : index
    %133 = vector.load %arg1[%c6_33, %132, %c0_34] : memref<16x8x128xf32, #tpu.memory_space<vmem>>, vector<1x8x128xf32>
    %134 = vector.shape_cast %133 : vector<1x8x128xf32> to vector<8x128xf32>
    %c7_35 = arith.constant 7 : index
    %135 = arith.index_cast %3 : i32 to index
    %c0_36 = arith.constant 0 : index
    %136 = vector.load %arg1[%c7_35, %135, %c0_36] : memref<16x8x128xf32, #tpu.memory_space<vmem>>, vector<1x8x128xf32>
    %137 = vector.shape_cast %136 : vector<1x8x128xf32> to vector<8x128xf32>
    %138 = arith.mulf %128, %43 : vector<8x128xf32>
    %139 = arith.mulf %131, %65 : vector<8x128xf32>
    %140 = arith.addf %138, %139 : vector<8x128xf32>
    %141 = arith.mulf %134, %70 : vector<8x128xf32>
    %142 = arith.addf %140, %141 : vector<8x128xf32>
    %c4_37 = arith.constant 4 : index
    %143 = arith.index_cast %3 : i32 to index
    %c0_38 = arith.constant 0 : index
    %144 = vector.load %arg3[%c4_37, %143, %c0_38] : memref<16x8x128xf32, #tpu.memory_space<vmem>>, vector<1x8x128xf32>
    %145 = vector.shape_cast %144 : vector<1x8x128xf32> to vector<8x128xf32>
    %146 = vector.shape_cast %142 : vector<8x128xf32> to vector<1x8x128xf32>
    tpu.vector_store %arg3[%c4_37, %143, %c0_38], %146 {strides = array<i32>} : memref<16x8x128xf32, #tpu.memory_space<vmem>>, vector<1x8x128xf32>,
    %147 = arith.mulf %128, %44 : vector<8x128xf32>
    %148 = arith.mulf %131, %66 : vector<8x128xf32>
    %149 = arith.addf %147, %148 : vector<8x128xf32>
    %150 = arith.mulf %134, %73 : vector<8x128xf32>
    %151 = arith.addf %149, %150 : vector<8x128xf32>
    %c5_39 = arith.constant 5 : index
    %152 = arith.index_cast %3 : i32 to index
    %c0_40 = arith.constant 0 : index
    %153 = vector.load %arg3[%c5_39, %152, %c0_40] : memref<16x8x128xf32, #tpu.memory_space<vmem>>, vector<1x8x128xf32>
    %154 = vector.shape_cast %153 : vector<1x8x128xf32> to vector<8x128xf32>
    %155 = vector.shape_cast %151 : vector<8x128xf32> to vector<1x8x128xf32>
    tpu.vector_store %arg3[%c5_39, %152, %c0_40], %155 {strides = array<i32>} : memref<16x8x128xf32, #tpu.memory_space<vmem>>, vector<1x8x128xf32>,
    %156 = arith.mulf %128, %45 : vector<8x128xf32>
    %157 = arith.mulf %131, %67 : vector<8x128xf32>
    %158 = arith.addf %156, %157 : vector<8x128xf32>
    %159 = arith.mulf %134, %76 : vector<8x128xf32>
    %160 = arith.addf %158, %159 : vector<8x128xf32>
    %c6_41 = arith.constant 6 : index
    %161 = arith.index_cast %3 : i32 to index
    %c0_42 = arith.constant 0 : index
    %162 = vector.load %arg3[%c6_41, %161, %c0_42] : memref<16x8x128xf32, #tpu.memory_space<vmem>>, vector<1x8x128xf32>
    %163 = vector.shape_cast %162 : vector<1x8x128xf32> to vector<8x128xf32>
    %164 = vector.shape_cast %160 : vector<8x128xf32> to vector<1x8x128xf32>
    tpu.vector_store %arg3[%c6_41, %161, %c0_42], %164 {strides = array<i32>} : memref<16x8x128xf32, #tpu.memory_space<vmem>>, vector<1x8x128xf32>,
    %165 = arith.mulf %128, %6 : vector<8x128xf32>
    %166 = arith.mulf %131, %9 : vector<8x128xf32>
    %167 = arith.addf %165, %166 : vector<8x128xf32>
    %168 = arith.mulf %134, %12 : vector<8x128xf32>
    %169 = arith.addf %167, %168 : vector<8x128xf32>
    %170 = arith.addf %169, %137 : vector<8x128xf32>
    %c7_43 = arith.constant 7 : index
    %171 = arith.index_cast %3 : i32 to index
    %c0_44 = arith.constant 0 : index
    %172 = vector.load %arg3[%c7_43, %171, %c0_44] : memref<16x8x128xf32, #tpu.memory_space<vmem>>, vector<1x8x128xf32>
    %173 = vector.shape_cast %172 : vector<1x8x128xf32> to vector<8x128xf32>
    %174 = vector.shape_cast %170 : vector<8x128xf32> to vector<1x8x128xf32>
    tpu.vector_store %arg3[%c7_43, %171, %c0_44], %174 {strides = array<i32>} : memref<16x8x128xf32, #tpu.memory_space<vmem>>, vector<1x8x128xf32>,
    %c8_45 = arith.constant 8 : index
    %175 = arith.index_cast %3 : i32 to index
    %c0_46 = arith.constant 0 : index
    %176 = vector.load %arg1[%c8_45, %175, %c0_46] : memref<16x8x128xf32, #tpu.memory_space<vmem>>, vector<1x8x128xf32>
    %177 = vector.shape_cast %176 : vector<1x8x128xf32> to vector<8x128xf32>
    %c9 = arith.constant 9 : index
    %178 = arith.index_cast %3 : i32 to index
    %c0_47 = arith.constant 0 : index
    %179 = vector.load %arg1[%c9, %178, %c0_47] : memref<16x8x128xf32, #tpu.memory_space<vmem>>, vector<1x8x128xf32>
    %180 = vector.shape_cast %179 : vector<1x8x128xf32> to vector<8x128xf32>
    %c10 = arith.constant 10 : index
    %181 = arith.index_cast %3 : i32 to index
    %c0_48 = arith.constant 0 : index
    %182 = vector.load %arg1[%c10, %181, %c0_48] : memref<16x8x128xf32, #tpu.memory_space<vmem>>, vector<1x8x128xf32>
    %183 = vector.shape_cast %182 : vector<1x8x128xf32> to vector<8x128xf32>
    %c11 = arith.constant 11 : index
    %184 = arith.index_cast %3 : i32 to index
    %c0_49 = arith.constant 0 : index
    %185 = vector.load %arg1[%c11, %184, %c0_49] : memref<16x8x128xf32, #tpu.memory_space<vmem>>, vector<1x8x128xf32>
    %186 = vector.shape_cast %185 : vector<1x8x128xf32> to vector<8x128xf32>
    %187 = arith.mulf %177, %43 : vector<8x128xf32>
    %188 = arith.mulf %180, %65 : vector<8x128xf32>
    %189 = arith.addf %187, %188 : vector<8x128xf32>
    %190 = arith.mulf %183, %70 : vector<8x128xf32>
    %191 = arith.addf %189, %190 : vector<8x128xf32>
    %c8_50 = arith.constant 8 : index
    %192 = arith.index_cast %3 : i32 to index
    %c0_51 = arith.constant 0 : index
    %193 = vector.load %arg3[%c8_50, %192, %c0_51] : memref<16x8x128xf32, #tpu.memory_space<vmem>>, vector<1x8x128xf32>
    %194 = vector.shape_cast %193 : vector<1x8x128xf32> to vector<8x128xf32>
    %195 = vector.shape_cast %191 : vector<8x128xf32> to vector<1x8x128xf32>
    tpu.vector_store %arg3[%c8_50, %192, %c0_51], %195 {strides = array<i32>} : memref<16x8x128xf32, #tpu.memory_space<vmem>>, vector<1x8x128xf32>,
    %196 = arith.mulf %177, %44 : vector<8x128xf32>
    %197 = arith.mulf %180, %66 : vector<8x128xf32>
    %198 = arith.addf %196, %197 : vector<8x128xf32>
    %199 = arith.mulf %183, %73 : vector<8x128xf32>
    %200 = arith.addf %198, %199 : vector<8x128xf32>
    %c9_52 = arith.constant 9 : index
    %201 = arith.index_cast %3 : i32 to index
    %c0_53 = arith.constant 0 : index
    %202 = vector.load %arg3[%c9_52, %201, %c0_53] : memref<16x8x128xf32, #tpu.memory_space<vmem>>, vector<1x8x128xf32>
    %203 = vector.shape_cast %202 : vector<1x8x128xf32> to vector<8x128xf32>
    %204 = vector.shape_cast %200 : vector<8x128xf32> to vector<1x8x128xf32>
    tpu.vector_store %arg3[%c9_52, %201, %c0_53], %204 {strides = array<i32>} : memref<16x8x128xf32, #tpu.memory_space<vmem>>, vector<1x8x128xf32>,
    %205 = arith.mulf %177, %45 : vector<8x128xf32>
    %206 = arith.mulf %180, %67 : vector<8x128xf32>
    %207 = arith.addf %205, %206 : vector<8x128xf32>
    %208 = arith.mulf %183, %76 : vector<8x128xf32>
    %209 = arith.addf %207, %208 : vector<8x128xf32>
    %c10_54 = arith.constant 10 : index
    %210 = arith.index_cast %3 : i32 to index
    %c0_55 = arith.constant 0 : index
    %211 = vector.load %arg3[%c10_54, %210, %c0_55] : memref<16x8x128xf32, #tpu.memory_space<vmem>>, vector<1x8x128xf32>
    %212 = vector.shape_cast %211 : vector<1x8x128xf32> to vector<8x128xf32>
    %213 = vector.shape_cast %209 : vector<8x128xf32> to vector<1x8x128xf32>
    tpu.vector_store %arg3[%c10_54, %210, %c0_55], %213 {strides = array<i32>} : memref<16x8x128xf32, #tpu.memory_space<vmem>>, vector<1x8x128xf32>,
    %214 = arith.mulf %177, %6 : vector<8x128xf32>
    %215 = arith.mulf %180, %9 : vector<8x128xf32>
    %216 = arith.addf %214, %215 : vector<8x128xf32>
    %217 = arith.mulf %183, %12 : vector<8x128xf32>
    %218 = arith.addf %216, %217 : vector<8x128xf32>
    %219 = arith.addf %218, %186 : vector<8x128xf32>
    %c11_56 = arith.constant 11 : index
    %220 = arith.index_cast %3 : i32 to index
    %c0_57 = arith.constant 0 : index
    %221 = vector.load %arg3[%c11_56, %220, %c0_57] : memref<16x8x128xf32, #tpu.memory_space<vmem>>, vector<1x8x128xf32>
    %222 = vector.shape_cast %221 : vector<1x8x128xf32> to vector<8x128xf32>
    %223 = vector.shape_cast %219 : vector<8x128xf32> to vector<1x8x128xf32>
    tpu.vector_store %arg3[%c11_56, %220, %c0_57], %223 {strides = array<i32>} : memref<16x8x128xf32, #tpu.memory_space<vmem>>, vector<1x8x128xf32>,
    %c12 = arith.constant 12 : index
    %224 = arith.index_cast %3 : i32 to index
    %c0_58 = arith.constant 0 : index
    %225 = vector.load %arg1[%c12, %224, %c0_58] : memref<16x8x128xf32, #tpu.memory_space<vmem>>, vector<1x8x128xf32>
    %226 = vector.shape_cast %225 : vector<1x8x128xf32> to vector<8x128xf32>
    %c13 = arith.constant 13 : index
    %227 = arith.index_cast %3 : i32 to index
    %c0_59 = arith.constant 0 : index
    %228 = vector.load %arg1[%c13, %227, %c0_59] : memref<16x8x128xf32, #tpu.memory_space<vmem>>, vector<1x8x128xf32>
    %229 = vector.shape_cast %228 : vector<1x8x128xf32> to vector<8x128xf32>
    %c14 = arith.constant 14 : index
    %230 = arith.index_cast %3 : i32 to index
    %c0_60 = arith.constant 0 : index
    %231 = vector.load %arg1[%c14, %230, %c0_60] : memref<16x8x128xf32, #tpu.memory_space<vmem>>, vector<1x8x128xf32>
    %232 = vector.shape_cast %231 : vector<1x8x128xf32> to vector<8x128xf32>
    %c15 = arith.constant 15 : index
    %233 = arith.index_cast %3 : i32 to index
    %c0_61 = arith.constant 0 : index
    %234 = vector.load %arg1[%c15, %233, %c0_61] : memref<16x8x128xf32, #tpu.memory_space<vmem>>, vector<1x8x128xf32>
    %235 = vector.shape_cast %234 : vector<1x8x128xf32> to vector<8x128xf32>
    %236 = arith.mulf %226, %43 : vector<8x128xf32>
    %237 = arith.mulf %229, %65 : vector<8x128xf32>
    %238 = arith.addf %236, %237 : vector<8x128xf32>
    %239 = arith.mulf %232, %70 : vector<8x128xf32>
    %240 = arith.addf %238, %239 : vector<8x128xf32>
    %c12_62 = arith.constant 12 : index
    %241 = arith.index_cast %3 : i32 to index
    %c0_63 = arith.constant 0 : index
    %242 = vector.load %arg3[%c12_62, %241, %c0_63] : memref<16x8x128xf32, #tpu.memory_space<vmem>>, vector<1x8x128xf32>
    %243 = vector.shape_cast %242 : vector<1x8x128xf32> to vector<8x128xf32>
    %244 = vector.shape_cast %240 : vector<8x128xf32> to vector<1x8x128xf32>
    tpu.vector_store %arg3[%c12_62, %241, %c0_63], %244 {strides = array<i32>} : memref<16x8x128xf32, #tpu.memory_space<vmem>>, vector<1x8x128xf32>,
    %245 = arith.mulf %226, %44 : vector<8x128xf32>
    %246 = arith.mulf %229, %66 : vector<8x128xf32>
    %247 = arith.addf %245, %246 : vector<8x128xf32>
    %248 = arith.mulf %232, %73 : vector<8x128xf32>
    %249 = arith.addf %247, %248 : vector<8x128xf32>
    %c13_64 = arith.constant 13 : index
    %250 = arith.index_cast %3 : i32 to index
    %c0_65 = arith.constant 0 : index
    %251 = vector.load %arg3[%c13_64, %250, %c0_65] : memref<16x8x128xf32, #tpu.memory_space<vmem>>, vector<1x8x128xf32>
    %252 = vector.shape_cast %251 : vector<1x8x128xf32> to vector<8x128xf32>
    %253 = vector.shape_cast %249 : vector<8x128xf32> to vector<1x8x128xf32>
    tpu.vector_store %arg3[%c13_64, %250, %c0_65], %253 {strides = array<i32>} : memref<16x8x128xf32, #tpu.memory_space<vmem>>, vector<1x8x128xf32>,
    %254 = arith.mulf %226, %45 : vector<8x128xf32>
    %255 = arith.mulf %229, %67 : vector<8x128xf32>
    %256 = arith.addf %254, %255 : vector<8x128xf32>
    %257 = arith.mulf %232, %76 : vector<8x128xf32>
    %258 = arith.addf %256, %257 : vector<8x128xf32>
    %c14_66 = arith.constant 14 : index
    %259 = arith.index_cast %3 : i32 to index
    %c0_67 = arith.constant 0 : index
    %260 = vector.load %arg3[%c14_66, %259, %c0_67] : memref<16x8x128xf32, #tpu.memory_space<vmem>>, vector<1x8x128xf32>
    %261 = vector.shape_cast %260 : vector<1x8x128xf32> to vector<8x128xf32>
    %262 = vector.shape_cast %258 : vector<8x128xf32> to vector<1x8x128xf32>
    tpu.vector_store %arg3[%c14_66, %259, %c0_67], %262 {strides = array<i32>} : memref<16x8x128xf32, #tpu.memory_space<vmem>>, vector<1x8x128xf32>,
    %263 = arith.mulf %226, %6 : vector<8x128xf32>
    %264 = arith.mulf %229, %9 : vector<8x128xf32>
    %265 = arith.addf %263, %264 : vector<8x128xf32>
    %266 = arith.mulf %232, %12 : vector<8x128xf32>
    %267 = arith.addf %265, %266 : vector<8x128xf32>
    %268 = arith.addf %267, %235 : vector<8x128xf32>
    %c15_68 = arith.constant 15 : index
    %269 = arith.index_cast %3 : i32 to index
    %c0_69 = arith.constant 0 : index
    %270 = vector.load %arg3[%c15_68, %269, %c0_69] : memref<16x8x128xf32, #tpu.memory_space<vmem>>, vector<1x8x128xf32>
    %271 = vector.shape_cast %270 : vector<1x8x128xf32> to vector<8x128xf32>
    %272 = vector.shape_cast %268 : vector<8x128xf32> to vector<1x8x128xf32>
    tpu.vector_store %arg3[%c15_68, %269, %c0_69], %272 {strides = array<i32>} : memref<16x8x128xf32, #tpu.memory_space<vmem>>, vector<1x8x128xf32>,
    %c1_i32_70 = arith.constant 1 : i32
    return
  }
  func.func @transform_0(%arg0: i32) -> (i32, i32, i32) {
    %c0_i32 = arith.constant 0 : i32
    %c0_i32_0 = arith.constant 0 : i32
    %c0_i32_1 = arith.constant 0 : i32
    return %c0_i32, %arg0, %c0_i32_0 : i32, i32, i32
  }
  func.func @transform_1(%arg0: i32) -> (i32, i32, i32) {
    %c0_i32 = arith.constant 0 : i32
    %c0_i32_0 = arith.constant 0 : i32
    %c0_i32_1 = arith.constant 0 : i32
    return %c0_i32, %arg0, %c0_i32_0 : i32, i32, i32
  }
  func.func @transform_2(%arg0: i32) -> (i32, i32, i32) {
    %c0_i32 = arith.constant 0 : i32
    %c0_i32_0 = arith.constant 0 : i32
    %c0_i32_1 = arith.constant 0 : i32
    return %c0_i32, %arg0, %c0_i32_0 : i32, i32, i32
  }
}

</mosaic_0001>

<bundles_post_ra>
// kernel: tpu_custom_call.1
= control target key start
LH: loop header
LB: loop body
LE: loop exit
PB: predicated region body
PF: predicated region fallthrough
CT: control target
= control target key end

     0   :  { %7 = vsyncpa [#allocation3], 0  ;;  %s1205_s0 = inlined_call_operand.hbm [shape: f32[16,16,128], index: 0, kind: input, shape index: {}]   ;;  %s1206_s1 = inlined_call_operand.hbm [shape: f32[9,16,128], index: 1, kind: input, shape index: {}]   ;;  %s1207_s2 = inlined_call_operand.hbm [shape: f32[16,16,128], index: 2, kind: output, shape index: {}]  }
   0x1   :  { %9 = vsyncpa [#allocation3 + $0x1], 0 }
   0x2   :  { %10 = vsyncpa [#allocation6], 0 }
   0x3   :  { %12 = vsyncpa [#allocation6 + $0x1], 0 }
   0x4   :  { %13 = vsyncpa [#allocation4], 0 }
   0x5   :  { %15 = vsyncpa [#allocation4 + $0x1], 0  ;;  %s837_s9 = smov 0   ;;  %s839_s10 = smov 0  }
   0x6   :  { %s841_s11 = smov 0   ;;  %s843_s12 = smov 0  }
   0x7 LB: > { %s858_s13 = sadd.s32 4294967295, %s811_s12   ;;  %s567_s14 = sadd.s32 4294967294, %s811_s12   ;;  %s811_s12 = sphi %s843_s12, %s1224_s12   ;;  %s807_s11 = sphi %s841_s11, %s1223_s11   ;;  %s803_s10 = sphi %s839_s10, %s1222_s10   ;;  %s799_s9 = sphi %s837_s9, %s1221_s9  }
   0x8   : > { %s862_s15 = sadd.s32 1, %s811_s12   ;;  %s28_s16 = sadd.s32 1, %s807_s11 }
   0x9   : > { %s25_s17 = ssub.s32 %s811_s12, %s862_s15  ;;  %p35_p0 = scmp.ne.s32.totalorder %s807_s11, %s803_s10 }
   0xa   : > { %p26_p1 = scmp.eq.s32.totalorder %s25_s17, 0  ;;  %p36_p2 = scmp.eq.s32.totalorder %s811_s12, 0 }
   0xb   : > { %p41_p3 = scmp.ne.s32.totalorder %s803_s10, %s799_s9  ;;  %p42_p4 = scmp.eq.s32.totalorder %s858_s13, 0 }
   0xc   : > { %s874_s18 = scalar_select %p26_p1, %s807_s11, %s28_s16  }
   0xd   : > { %p876_p5 = por %p36_p2, %p35_p0  ;;  %p880_p6 = por %p42_p4, %p41_p3 }
   0xe   : > { %p91_p7 = scmp.eq.s32.totalorder %s858_s13, 1  ;;  %p97_p8 = scmp.eq.s32.totalorder %s567_s14, 1 }
   0xf   : > { %s1211_s20 = scalar_select %p880_p6, 1, 0 }
  0x10   : > { %p637_p10 = scmp.lt.s32.totalorder %s811_s12, 2  ;;  %p887_p11 = por %p91_p7, %p35_p0 }
  0x11   : > { %p891_p12 = por %p97_p8, %p41_p3  ;;  %s896_s23 = sand.u32 1, %s807_s11  }
  0x12   : > { %s1212_s21 = scalar_select %p887_p11, 1, 0 }
  0x13   : > { %s1213_s22 = scalar_select %p891_p12, 1, 0 }
  0x14   : > { %s571_s24 = sshll.u32 %s811_s12, 7  ;;  %s570_s25 = sshll.u32 %s896_s23, 7 }
  0x15   : > { %s905_s28 = scalar_lea.hbm %s1205_s0, %s571_s24  ;;  %s121_s29 = scalar_lea.vmem [#allocation2], %s570_s25 }
  0x16   : > { %s127_s30 = sshll.u32 %s121_s29, 4  ;;  %p909_p13 = pnand %p637_p10, %p876_p5  ;;  %s913_s30 = int_to_ptr.vmem [resolvable:$true] %s127_s30 }
  0x17   : > { %s118_s4 = scalar_lea.sflag [#allocation3], %s896_s23  ;;  %s681_s5 = scalar_lea.hbm %s905_s28, 2048 }
  0x18   : > { %p682_p1 = scmp.ne.s32.totalorder %s905_s28, %s681_s5  ;;  %p683_p2 = pneg %p909_p13 }
  0x19   : > { %s686_s8 = scalar_lea.hbm %s1205_s0, 4096  ;;  %p687_p5 = scmp.lt.u32.totalorder %s905_s28, %s1205_s0 }
  0x1a   : > { %p684_p3 = pnand %p683_p2, %p682_p1  ;;  %p688_p7 = scmp.lt.u32.totalorder %s686_s8, %s681_s5 }
  0x1b   : > { %p690_p10 = scmp.lt.u32.totalorder %s681_s5, %s905_s28 }
  0x1c   : > { %p685_p4 = pneg %p684_p3  ;;  %p689_p8 = por %p688_p7, %p687_p5 }
  0x1e   : > { %p691_p9 = por %p690_p10, %p689_p8 }
  0x20   : > { %p692_p0 = pnand %p691_p9, %p685_p4 }
  0x22   : > { %695 = shalt.err (!%p692_p0)
}
  0x23   : > { %s696_s17 = scalar_lea.vmem %s913_s30, 2048  ;;  %s813_s19 = smov [#allocation2]  }
  0x24   : > { %p697_p1 = scmp.ne.s32.totalorder %s913_s30, %s696_s17  ;;  %s701_s25 = sshll.u32 %s813_s19, 4  ;;  %s702_s25 = int_to_ptr.vmem [resolvable:$false] %s701_s25 }
  0x25   : > { %s703_s26 = scalar_lea.vmem %s702_s25, 4096  ;;  %p704_p11 = scmp.lt.s32.totalorder %s913_s30, %s702_s25 }
  0x26   : > { %p699_p3 = pnand %p697_p1, %p683_p2  ;;  %p705_p5 = scmp.lt.s32.totalorder %s703_s26, %s696_s17 }
  0x28   : > { %p700_p12 = pneg %p699_p3  ;;  %p706_p7 = por %p705_p5, %p704_p11 }
  0x2a   : > { %p707_p8 = pnand %p706_p7, %p700_p12 }
  0x2c   : > { %710 = shalt.err (!%p707_p8)
}
  0x2d   : > { %s814_s27 = smov 256   ;;  %s815_s29 = smov 128  }
  0x2e   : > { %s816_s5 = smov 8   ;;  %p155_p9 = scmp.lt.s32.totalorder %s811_s12, 3 }
  0x2f   : > { %629 = dma.hbm_to_vmem [thread:$0]  (!%p909_p13), %s905_s28, 2048, %s913_s30, %s118_s4, %s814_s27, %s815_s29, %s816_s5  }
  0x30   : > { %s618_s6 = smul.u32 72, %s896_s23  ;;  %p1215_p11 = scmp.ge.s32.totalorder %s811_s12, 1 }
  0x31   : > { %s960_s16 = scalar_lea.hbm %s1206_s1, %s571_s24  ;;  %s138_s28 = scalar_lea.sflag [#allocation6], %s896_s23 }
  0x32   : > { %p951_p12 = pnand %p1215_p11, %p155_p9  ;;  %s141_s17 = scalar_lea.vmem [#allocation5], %s618_s6 }
  0x33   : > { %s147_s19 = sshll.u32 %s141_s17, 4  ;;  %s711_s30 = scalar_lea.hbm %s960_s16, 1152  ;;  %s962_s19 = int_to_ptr.vmem [resolvable:$true] %s147_s19 }
  0x34   : > { %p712_p0 = scmp.ne.s32.totalorder %s960_s16, %s711_s30  ;;  %s716_s24 = scalar_lea.hbm %s1206_s1, 2304 }
  0x35   : > { %p717_p1 = scmp.lt.u32.totalorder %s960_s16, %s1206_s1  ;;  %p718_p3 = scmp.lt.u32.totalorder %s716_s24, %s711_s30 }
  0x36   : > { %p714_p4 = pnand %p712_p0, %p683_p2  ;;  %p720_p7 = scmp.lt.u32.totalorder %s711_s30, %s960_s16 }
  0x37   : > { %p719_p5 = por %p718_p3, %p717_p1 }
  0x38   : > { %p715_p10 = pneg %p714_p4 }
  0x39   : > { %p721_p8 = por %p720_p7, %p719_p5 }
  0x3b   : > { %p722_p9 = pnand %p721_p8, %p715_p10 }
  0x3d   : > { %725 = shalt.err (!%p722_p9)
}
  0x3e   : > { %s726_s6 = scalar_lea.vmem %s962_s19, 1152  ;;  %s817_s14 = smov [#allocation5]  }
  0x3f   : > { %p727_p11 = scmp.ne.s32.totalorder %s962_s19, %s726_s6  ;;  %s731_s17 = sshll.u32 %s817_s14, 4  ;;  %s732_s17 = int_to_ptr.vmem [resolvable:$false] %s731_s17 }
  0x40   : > { %s733_s4 = scalar_lea.vmem %s732_s17, 2304  ;;  %p734_p6 = scmp.lt.s32.totalorder %s962_s19, %s732_s17 }
  0x41   : > { %p729_p0 = pnand %p727_p11, %p683_p2  ;;  %p735_p1 = scmp.lt.s32.totalorder %s733_s4, %s726_s6 }
  0x43   : > { %p730_p4 = pneg %p729_p0  ;;  %p736_p3 = por %p735_p1, %p734_p6 }
  0x45   : > { %p737_p5 = pnand %p736_p3, %p730_p4 }
  0x47   : > { %740 = shalt.err (!%p737_p5)
}
  0x48   : > { %632 = dma.hbm_to_vmem [thread:$0]  (!%p909_p13), %s960_s16, 1152, %s962_s19, %s138_s28, %s814_s27, %s815_s29, %s816_s5  }
  0x49   : > { %159 = sbr.rel (%p951_p12) target bundleno = 174 (0xae), region = 28  ;;  %s996_s30 = sand.u32 (!%p951_p12), 1, %s803_s10  }
  0x4a   : > { %s574_s25 = sshll.u32 (!%p951_p12), %s996_s30, 7  ;;  %s162_s3 = scalar_lea.sflag (!%p951_p12), [#allocation3], %s996_s30 }
  0x4b   : > { %s1002_s24 = scalar_lea.vmem (!%p951_p12), [#allocation2], %s574_s25  ;;  %p1217_p6 = scmp.ne.s32.totalorder (!%p951_p12), %s1211_s20, 0 }
  0x50   : > { %786 = dma.done.wait (%p1217_p6), %s162_s3, 2048  }
  0x51   : > { %788 = vsyncadd (%p1217_p6), %s162_s3, 4294965248  ;;  %s619_s23 = smul.u32 72, %s996_s30  ;;  %s171_s27 = scalar_lea.sflag [#allocation6], %s996_s30 }
  0x53   : > { %s1010_s29 = scalar_lea.vmem [#allocation5], %s619_s23 }
  0x54   : > { %790 = dma.done.wait (%p1217_p6), %s171_s27, 1152  }
  0x55   : > { %792 = vsyncadd (%p1217_p6), %s171_s27, 4294966144  ;;  %v578_v0 = vld [vmem:[%s1010_s29 + $0x18] sm:$0xff]  ;;  %v1018_v1 = vld [vmem:[%s1010_s29 + $0x20] sm:$0xff]  ;;  %s1084_s20 = scalar_lea.vmem [#allocation7], %s574_s25  ;;  %s615_s5 = sshll.u32 %s858_s13, 7 }
  0x56   : > { %v1021_v2 = vld [vmem:[%s1010_s29 + $0x28] sm:$0xff]  ;;  %v210_v3 = vadd.f32 1.0, %v578_v0  ;;  %v228_v4 = vmul.f32 %v1018_v1, %v1018_v1  ;;  %v1026_v5 = vld [vmem:[%s1002_s24] sm:$0xff]  ;;  %v577_v12 = vld [vmem:[%s1010_s29 + $0x10] sm:$0xff]  ;;  %s433_s7 = sshll.u32 %s1084_s20, 4  ;;  %s1155_s19 = scalar_lea.hbm %s1207_s2, %s615_s5  ;;  %s1159_s7 = int_to_ptr.vmem [resolvable:$true] %s433_s7 }
  0x57   : > { %v1029_v6 = vld [vmem:[%s1002_s24 + $0x8] sm:$0xff]  ;;  %v1032_v7 = vld [vmem:[%s1002_s24 + $0x10] sm:$0xff]  ;;  %v230_v9 = vmul.f32 %v1021_v2, %v1021_v2  ;;  %v1043_v16 = vld [vmem:[%s1002_s24 + $0x20] sm:$0xff]  ;;  %s421_s28 = scalar_lea.sflag [#allocation4], %s996_s30  ;;  %s741_s26 = scalar_lea.vmem %s1159_s7, 2048 }
  0x58   : > { %v227_v8 = vmul.f32 %v210_v3, %v210_v3  ;;  %v200_v10 = vld [vmem:[%s1010_s29] sm:$0xff]  ;;  %v576_v11 = vld [vmem:[%s1010_s29 + $0x8] sm:$0xff]  ;;  %v297_v15 = vmul.f32 %v1032_v7, %v577_v12  ;;  %v586_v23 = vld [vmem:[%s1002_s24 + $0x18] sm:$0xff]  ;;  %p742_p13 = scmp.ne.s32.totalorder %s1159_s7, %s741_s26  ;;  %p1218_p2 = scmp.ne.s32.totalorder %s1212_s21, 0 }
  0x59   : > { %v294_v13 = vmul.f32 %v1026_v5, %v200_v10  ;;  %v295_v14 = vmul.f32 %v1029_v6, %v576_v11  ;;  %v1046_v17 = vld [vmem:[%s1002_s24 + $0x28] sm:$0xff]  ;;  %v1049_v19 = vld [vmem:[%s1002_s24 + $0x30] sm:$0xff]  ;;  %v331_v20 = vmul.f32 %v1043_v16, %v200_v10  ;;  %v1054_v22 = vld [vmem:[%s1002_s24 + $0x40] sm:$0xff]  ;;  %s818_s8 = smov [#allocation7]  }
  0x5a   : > { %v229_v18 = vadd.f32 %v228_v4, %v227_v8  ;;  %v332_v21 = vmul.f32 %v1046_v17, %v576_v11  ;;  %v334_v25 = vmul.f32 %v1049_v19, %v577_v12  ;;  %v1059_v26 = vld [vmem:[%s1002_s24 + $0x48] sm:$0xff]  ;;  %v1062_v27 = vld [vmem:[%s1002_s24 + $0x50] sm:$0xff]  ;;  %v371_v28 = vmul.f32 %v1054_v22, %v200_v10  ;;  %v1068_v33 = vld [vmem:[%s1002_s24 + $0x60] sm:$0xff]  ;;  %p743_p12 = pnand %p742_p13, %p1218_p2  ;;  %s745_s6 = sshll.u32 %s818_s8, 4  ;;  %s746_s6 = int_to_ptr.vmem [resolvable:$false] %s745_s6 }
  0x5b   : > { %v296_v24 = vadd.f32 %v295_v14, %v294_v13  ;;  %v372_v31 = vmul.f32 %v1059_v26, %v576_v11  ;;  %v374_v32 = vmul.f32 %v1062_v27, %v577_v12  ;;  %v1071_v34 = vld [vmem:[%s1002_s24 + $0x68] sm:$0xff]  ;;  %v1074_v35 = vld [vmem:[%s1002_s24 + $0x70] sm:$0xff]  ;;  %v593_v37 = vld [vmem:[%s1002_s24 + $0x38] sm:$0xff]  ;;  %v412_v38 = vmul.f32 %v1068_v33, %v200_v10  ;;  %s747_s14 = scalar_lea.vmem %s746_s6, 4096  ;;  %p748_p7 = scmp.lt.s32.totalorder %s1159_s7, %s746_s6 }
  0x5c   : > { %v231_v29 = vadd.f32 %v230_v9, %v229_v18  ;;  %v333_v30 = vadd.f32 %v332_v21, %v331_v20  ;;  %v413_v39 = vmul.f32 %v1071_v34, %v576_v11  ;;  %v415_v40 = vmul.f32 %v1074_v35, %v577_v12  ;;  %v601_v45 = vld [vmem:[%s1002_s24 + $0x58] sm:$0xff]  ;;  %v583_v57 = vld [vmem:[%s1010_s29 + $0x40] sm:$0xff]  ;;  %p744_p10 = pneg %p743_p12  ;;  %p749_p8 = scmp.lt.s32.totalorder %s747_s14, %s741_s26 }
  0x5d   : > { %v298_v36 = vadd.f32 %v297_v15, %v296_v24  ;;  %v373_v43 = vadd.f32 %v372_v31, %v371_v28  ;;  %v609_v49 = vld [vmem:[%s1002_s24 + $0x78] sm:$0xff] }
  0x5e   : > { %v232_v41 = vmax.f32 %v231_v29, 1e-24  ;;  %v335_v42 = vadd.f32 %v334_v25, %v333_v30  ;;  %v414_v46 = vadd.f32 %v413_v39, %v412_v38  ;;  %v582_v53 = vld [vmem:[%s1010_s29 + $0x38] sm:$0xff]  ;;  %v581_v56 = vld [vmem:[%s1010_s29 + $0x30] sm:$0xff]  ;;  %p750_p9 = por %p749_p8, %p748_p7 }
  0x5f   : > { %v299_v44 = vadd.f32 %v586_v23, %v298_v36  ;;  %v375_v48 = vadd.f32 %v374_v32, %v373_v43  ;;  %v223_v54 = vadd.f32 1.0, %v582_v53 }
  0x60   : > { %677 = vrsqrt.f32 %v232_v41  ;;  %v336_v47 = vadd.f32 %v593_v37, %v335_v42  ;;  %v416_v50 = vadd.f32 %v415_v40, %v414_v46  ;;  %p751_p11 = pnand %p750_p9, %p744_p10 }
  0x61   : > { %589 = vst [vmem:[%s1084_s20 + $0x18] sm:$0xff] %v299_v44  ;;  %v376_v51 = vadd.f32 %v601_v45, %v375_v48 }
  0x62   : > { %597 = vst [vmem:[%s1084_s20 + $0x38] sm:$0xff] %v336_v47  ;;  %v417_v52 = vadd.f32 %v609_v49, %v416_v50 }
  0x63   : > { %605 = vst [vmem:[%s1084_s20 + $0x58] sm:$0xff] %v376_v51 }
  0x64   : > { %613 = vst [vmem:[%s1084_s20 + $0x78] sm:$0xff] %v417_v52 }
  0x6a   : > { %v678_v55 = vpop.eup %677 }
  0x6b   : > { %v234_v58 = vmul.f32 %v678_v55, %v210_v3  ;;  %v235_v59 = vmul.f32 %v678_v55, %v1018_v1  ;;  %v236_v60 = vmul.f32 %v678_v55, %v1021_v2 }
  0x6d   : > { %v237_v61 = vmul.f32 %v581_v56, %v234_v58  ;;  %v238_v62 = vmul.f32 %v235_v59, %v223_v54  ;;  %v240_v63 = vmul.f32 %v583_v57, %v236_v60  ;;  %v274_v1 = vmul.f32 %v1026_v5, %v234_v58 }
  0x6e   : > { %v280_v2 = vmul.f32 %v1026_v5, %v235_v59  ;;  %v287_v23 = vmul.f32 %v1026_v5, %v236_v60  ;;  %v310_v25 = vmul.f32 %v1043_v16, %v234_v58  ;;  %v317_v28 = vmul.f32 %v1043_v16, %v235_v59 }
  0x6f   : > { %v239_v0 = vadd.f32 %v238_v62, %v237_v61  ;;  %v324_v29 = vmul.f32 %v1043_v16, %v236_v60  ;;  %v350_v30 = vmul.f32 %v1054_v22, %v234_v58  ;;  %v357_v37 = vmul.f32 %v1054_v22, %v235_v59 }
  0x70   : > { %v364_v38 = vmul.f32 %v1054_v22, %v236_v60  ;;  %v391_v39 = vmul.f32 %v1068_v33, %v234_v58  ;;  %v398_v5 = vmul.f32 %v1068_v33, %v235_v59  ;;  %v1109_v40 = vmul.f32 %v1068_v33, %v236_v60 }
  0x71   : > { %v241_v4 = vadd.f32 %v240_v63, %v239_v0 }
  0x73   : > { %v242_v8 = vmul.f32 %v241_v4, %v234_v58  ;;  %v244_v9 = vmul.f32 %v241_v4, %v235_v59  ;;  %v246_v10 = vmul.f32 %v241_v4, %v236_v60 }
  0x75   : > { %v243_v11 = vsub.f32 %v581_v56, %v242_v8  ;;  %v245_v12 = vsub.f32 %v223_v54, %v244_v9  ;;  %v247_v13 = vsub.f32 %v583_v57, %v246_v10 }
  0x77   : > { %v248_v14 = vmul.f32 %v243_v11, %v243_v11  ;;  %v249_v15 = vmul.f32 %v245_v12, %v245_v12  ;;  %v251_v18 = vmul.f32 %v247_v13, %v247_v13 }
  0x79   : > { %v250_v20 = vadd.f32 %v249_v15, %v248_v14 }
  0x7b   : > { %v252_v3 = vadd.f32 %v251_v18, %v250_v20 }
  0x7d   : > { %v253_v21 = vmax.f32 %v252_v3, 1e-24 }
  0x7f   : > { %679 = vrsqrt.f32 %v253_v21 }
  0x89   : > { %v680_v24 = vpop.eup %679 }
  0x8a   : > { %v255_v31 = vmul.f32 %v680_v24, %v243_v11  ;;  %v256_v32 = vmul.f32 %v680_v24, %v245_v12  ;;  %v1102_v36 = vmul.f32 %v680_v24, %v247_v13 }
  0x8c   : > { %v258_v41 = vmul.f32 %v1102_v36, %v235_v59  ;;  %v259_v16 = vmul.f32 %v256_v32, %v236_v60  ;;  %v275_v42 = vmul.f32 %v1029_v6, %v255_v31  ;;  %v261_v43 = vmul.f32 %v255_v31, %v236_v60 }
  0x8d   : > { %v262_v44 = vmul.f32 %v1102_v36, %v234_v58  ;;  %v281_v45 = vmul.f32 %v1029_v6, %v256_v32  ;;  %v264_v46 = vmul.f32 %v256_v32, %v234_v58  ;;  %v265_v47 = vmul.f32 %v255_v31, %v235_v59 }
  0x8e   : > { %v260_v22 = vsub.f32 %v258_v41, %v259_v16  ;;  %v276_v48 = vadd.f32 %v275_v42, %v274_v1  ;;  %v288_v49 = vmul.f32 %v1029_v6, %v1102_v36  ;;  %v311_v33 = vmul.f32 %v1046_v17, %v255_v31 }
  0x8f   : > { %v263_v50 = vsub.f32 %v261_v43, %v262_v44  ;;  %v282_v51 = vadd.f32 %v281_v45, %v280_v2  ;;  %v266_v52 = vsub.f32 %v264_v46, %v265_v47  ;;  %v318_v53 = vmul.f32 %v1046_v17, %v256_v32 }
  0x90   : > { %v277_v54 = vmul.f32 %v1032_v7, %v260_v22  ;;  %v289_v55 = vadd.f32 %v288_v49, %v287_v23  ;;  %v312_v56 = vadd.f32 %v311_v33, %v310_v25  ;;  %v313_v57 = vmul.f32 %v1049_v19, %v260_v22 }
  0x91   : > { %v283_v58 = vmul.f32 %v1032_v7, %v263_v50  ;;  %v290_v59 = vmul.f32 %v1032_v7, %v266_v52  ;;  %v319_v6 = vadd.f32 %v318_v53, %v317_v28  ;;  %v320_v60 = vmul.f32 %v1049_v19, %v263_v50 }
  0x92   : > { %v278_v61 = vadd.f32 %v277_v54, %v276_v48  ;;  %v314_v62 = vadd.f32 %v313_v57, %v312_v56  ;;  %v325_v63 = vmul.f32 %v1046_v17, %v1102_v36  ;;  %v327_v0 = vmul.f32 %v1049_v19, %v266_v52 }
  0x93   : > { %v284_v4 = vadd.f32 %v283_v58, %v282_v51  ;;  %v291_v8 = vadd.f32 %v290_v59, %v289_v55  ;;  %v321_v9 = vadd.f32 %v320_v60, %v319_v6  ;;  %v351_v10 = vmul.f32 %v1059_v26, %v255_v31 }
  0x94   : > { %279 = vst [vmem:[%s1084_s20] sm:$0xff] %v278_v61  ;;  %594 = vst [vmem:[%s1084_s20 + $0x20] sm:$0xff] %v314_v62  ;;  %v326_v7 = vadd.f32 %v325_v63, %v324_v29  ;;  %v353_v11 = vmul.f32 %v1062_v27, %v260_v22  ;;  %v358_v12 = vmul.f32 %v1059_v26, %v256_v32 }
  0x95   : > { %v360_v13 = vmul.f32 %v1062_v27, %v263_v50  ;;  %587 = vst [vmem:[%s1084_s20 + $0x8] sm:$0xff] %v284_v4  ;;  %588 = vst [vmem:[%s1084_s20 + $0x10] sm:$0xff] %v291_v8  ;;  %v352_v17 = vadd.f32 %v351_v10, %v350_v30  ;;  %v365_v19 = vmul.f32 %v1059_v26, %v1102_v36 }
  0x96   : > { %595 = vst [vmem:[%s1084_s20 + $0x28] sm:$0xff] %v321_v9  ;;  %v367_v14 = vmul.f32 %v1062_v27, %v266_v52  ;;  %v392_v15 = vmul.f32 %v1071_v34, %v255_v31  ;;  %v328_v18 = vadd.f32 %v327_v0, %v326_v7  ;;  %v359_v20 = vadd.f32 %v358_v12, %v357_v37 }
  0x97   : > { %v394_v3 = vmul.f32 %v1074_v35, %v260_v22  ;;  %v399_v21 = vmul.f32 %v1071_v34, %v256_v32  ;;  %v354_v1 = vadd.f32 %v353_v11, %v352_v17  ;;  %v366_v2 = vadd.f32 %v365_v19, %v364_v38 }
  0x98   : > { %v393_v23 = vadd.f32 %v392_v15, %v391_v39  ;;  %v401_v24 = vmul.f32 %v1074_v35, %v263_v50  ;;  %596 = vst [vmem:[%s1084_s20 + $0x30] sm:$0xff] %v328_v18  ;;  %v361_v26 = vadd.f32 %v360_v13, %v359_v20  ;;  %v406_v25 = vmul.f32 %v1071_v34, %v1102_v36 }
  0x99   : > { %v400_v27 = vadd.f32 %v399_v21, %v398_v5  ;;  %v408_v28 = vmul.f32 %v1074_v35, %v266_v52  ;;  %602 = vst [vmem:[%s1084_s20 + $0x40] sm:$0xff] %v354_v1  ;;  %v368_v29 = vadd.f32 %v367_v14, %v366_v2 }
  0x9a   : > { %v395_v30 = vadd.f32 %v394_v3, %v393_v23  ;;  %603 = vst [vmem:[%s1084_s20 + $0x48] sm:$0xff] %v361_v26  ;;  %v407_v32 = vadd.f32 %v406_v25, %v1109_v40 }
  0x9b   : > { %v402_v31 = vadd.f32 %v401_v24, %v400_v27  ;;  %604 = vst [vmem:[%s1084_s20 + $0x50] sm:$0xff] %v368_v29 }
  0x9c   : > { %610 = vst [vmem:[%s1084_s20 + $0x60] sm:$0xff] %v395_v30  ;;  %v409_v34 = vadd.f32 %v408_v28, %v407_v32 }
  0x9d   : > { %611 = vst [vmem:[%s1084_s20 + $0x68] sm:$0xff] %v402_v31 }
  0x9e   : > { %612 = vst [vmem:[%s1084_s20 + $0x70] sm:$0xff] %v409_v34 }
  0x9f   : > { %754 = shalt.err (!%p751_p11)
}
  0xa0   : > { %s755_s17 = scalar_lea.hbm %s1155_s19, 2048  ;;  %s759_s3 = scalar_lea.hbm %s1207_s2, 4096 }
  0xa1   : > { %p756_p0 = scmp.ne.s32.totalorder %s1155_s19, %s755_s17  ;;  %p760_p3 = scmp.lt.u32.totalorder %s1155_s19, %s1207_s2 }
  0xa2   : > { %p761_p5 = scmp.lt.u32.totalorder %s759_s3, %s755_s17  ;;  %p763_p13 = scmp.lt.u32.totalorder %s755_s17, %s1155_s19 }
  0xa3   : > { %p757_p4 = pnand %p756_p0, %p1218_p2 }
  0xa4   : > { %p762_p6 = por %p761_p5, %p760_p3 }
  0xa5   : > { %p758_p1 = pneg %p757_p4 }
  0xa6   : > { %p764_p12 = por %p763_p13, %p762_p6 }
  0xa8   : > { %p765_p10 = pnand %p764_p12, %p758_p1 }
  0xaa   : > { %768 = shalt.err (!%p765_p10)
}
  0xab   : > { %s819_s27 = smov 128   ;;  %s820_s29 = smov 256  }
  0xac   : > { %s821_s20 = smov 8  }
  0xad   : > { %624 = dma.vmem_to_hbm [thread:$0]  (%p1218_p2), %s1159_s7, 2048, %s1155_s19, %s421_s28, %s819_s27, %s820_s29, %s821_s20  }
  0xae PF: > { %s448_s5 = sand.u32 1, %s799_s9   ;;  %p1219_p7 = scmp.ne.s32.totalorder %s1213_s22, 0 }
  0xaf   : > { %p1220_p8 = scmp.ge.s32.totalorder %s811_s12, 2  ;;  %s449_s13 = scalar_lea.sflag [#allocation4], %s448_s5 }
  0xb1   : > { %p634_p9 = pnand %p1220_p8, %p1219_p7 }
  0xb3   : > { %794 = dma.done.wait (!%p634_p9), %s449_s13, 2048  }
  0xb4   : > { %796 = vsyncadd (!%p634_p9), %s449_s13, 4294965248  ;;  %p18_p11 = scmp.ge.s32.totalorder %s862_s15, 4   ;;  %s1221_s9 = smov %s803_s10 }
  0xb5   : > { %s1222_s10 = smov %s807_s11  ;;  %s1223_s11 = smov %s874_s18 }
  0xb6   : > { %s1224_s12 = smov %s862_s15  ;;  %20 = sbr.rel (!%p18_p11) target bundleno = 7 (0x7), region = 124 }
  0xbd   :  { %454 = vsyncpa [#allocation3], 1 }
  0xbe   :  { %456 = vsyncpa [#allocation3 + $0x1], 1 }
  0xbf   :  { %457 = vsyncpa [#allocation6], 1 }
  0xc0   :  { %459 = vsyncpa [#allocation6 + $0x1], 1 }
  0xc1   :  { %460 = vsyncpa [#allocation4], 1 }
  0xc2   :  { %462 = vsyncpa [#allocation4 + $0x1], 1 }

</bundles_post_ra>
